<compile_context>
chip_gen: v5e
topology: v5e:2x2
jax: 0.10.0
libtpu: 0.0.40
codegen_flags: <defaults>
</compile_context>

<pallas_src>
import jax
import jax.numpy as jnp
from jax.experimental import pallas as pl
from jax.experimental.pallas import tpu as pltpu


def _round_up(x, m):
    return (x + m - 1) // m * m


def _cdiv(a, b):
    return -(-a // b)


def _balanced_tile(dim, align, t_max):
    """Pick a tile size (multiple of `align`, <= t_max) so that the padded
    extent is tile * n_tiles with minimal padding (only up to next `align`,
    never up to the next full t_max). Returns (tile, padded, n_tiles)."""
    dim_al = _round_up(max(dim, 1), align)
    if dim_al <= t_max:
        return dim_al, dim_al, 1
    n = _cdiv(dim_al, t_max)
    tile = _round_up(_cdiv(dim_al, n), align)
    return tile, tile * n, n


def _tpu_caps():
    """Per-generation tile caps / VMEM ceiling / megacore hint."""
    vmem = None
    try:
        vmem = int(pltpu.get_tpu_info().vmem_capacity_bytes)
    except Exception:
        pass
    if vmem is None:
        try:
            kind = jax.devices()[0].device_kind.lower()
        except Exception:
            kind = ""
        vmem = (64 << 20) if "v7" in kind else (128 << 20)
    if vmem >= (100 << 20):
        # v5e / v6e: 128 MiB VMEM -> bigger blocks amortize per-step overhead.
        return dict(tm_max=512, tn_max=512, tk_max=1024,
                    vmem_cap=96 << 20, min_parallel_blocks=1)
    # v7x (64 MiB per TensorCore) or unknown: conservative tiles, 2 TCs.
    return dict(tm_max=256, tn_max=256, tk_max=512,
                vmem_cap=40 << 20, min_parallel_blocks=2)


# ---------------------------------------------------------------------------
# Kernels
# ---------------------------------------------------------------------------

def _mm_bias_kernel(x_ref, w_ref, b_ref, o_ref):
    """Single K step: o = x @ w + b, written directly (no scratch)."""
    acc = jnp.dot(x_ref[...].astype(w_ref.dtype), w_ref[...],
                  preferred_element_type=jnp.float32)
    o_ref[...] = (acc + b_ref[...].astype(jnp.float32)).astype(o_ref.dtype)


def _mm_bias_acc_kernel(x_ref, w_ref, b_ref, o_ref, acc_ref):
    """Multi K step: f32 VMEM accumulator, bias epilogue on last K step."""
    k = pl.program_id(2)

    @pl.when(k == 0)
    def _init():
        acc_ref[...] = jnp.zeros_like(acc_ref)

    acc_ref[...] += jnp.dot(x_ref[...].astype(w_ref.dtype), w_ref[...],
                            preferred_element_type=jnp.float32)

    @pl.when(k == pl.num_programs(2) - 1)
    def _finalize():
        o_ref[...] = (acc_ref[...] + b_ref[...].astype(jnp.float32)).astype(o_ref.dtype)


# ---------------------------------------------------------------------------
# Wrapper with one-time parameter prep (the "module")
# ---------------------------------------------------------------------------

def make_flatten_head(weight, bias, *, compute_dtype=jnp.bfloat16, out_dtype=None):
    """weight: [target_window, nf] (torch nn.Linear layout); bias: [target_window].
    Returns forward(x: [B, n_vars, d_model, patch_num]) -> [B, n_vars, target_window].

    Weight/bias padding, K-major transpose and dtype cast happen ONCE here, not
    per forward call. Use compute_dtype=jnp.float32 for a full-precision path."""
    tw, nf = weight.shape
    caps = _tpu_caps()

    tn, Np, n_n = _balanced_tile(tw, 128, caps["tn_max"])
    tk, Kp, n_k = _balanced_tile(nf, 128, caps["tk_max"])

    # v7x: make sure there are >=2 parallel (i,j) blocks when N allows it,
    # so both TensorCores get work (extra N padding is paid back 2x).
    if caps["min_parallel_blocks"] > 1 and n_n == 1 and Np >= 256:
        n_n = 2
        tn = _round_up(_cdiv(Np, 2), 128)
        Np = tn * n_n

    # One-time prep: K-major [nf, tw] -> padded [Kp, Np] in compute_dtype.
    w_kmaj = jnp.pad(weight.T.astype(compute_dtype), ((0, Kp - nf), (0, Np - tw)))
    b_pad = jnp.pad(bias.astype(jnp.float32).reshape(1, tw), ((0, 0), (0, Np - tw)))

    w_bytes = jnp.dtype(compute_dtype).itemsize

    def forward(x):
        B, n_vars, d_model, patch_num = x.shape
        assert d_model * patch_num == nf, "d_model * patch_num must equal nf"
        M = B * n_vars

        tm, Mp, n_m = _balanced_tile(M, 8, caps["tm_max"])
        # v7x: if still a single parallel block, split M instead (call-time only).
        if caps["min_parallel_blocks"] > 1 and n_m * n_n == 1 and Mp >= 16:
            n_m = 2
            tm = _round_up(_cdiv(Mp, 2), 8)
            Mp = tm * n_m

        # Flatten(start_dim=-2) + zero-pad to the (balanced) tile-aligned shape.
        x2d = x.reshape(M, nf)
        if (Mp, Kp) != (M, nf):
            x2d = jnp.pad(x2d, ((0, Mp - M), (0, Kp - nf)))

        odt = out_dtype or x.dtype
        x_bytes = x2d.dtype.itemsize
        o_bytes = jnp.dtype(odt).itemsize

        if n_k == 1:
            # Common case: nf fits one K tile -> no K axis, no accumulator.
            vmem_need = (2 * (tm * Kp * x_bytes + Kp * tn * w_bytes)
                         + 2 * tm * tn * o_bytes + 2 * tn * 4)
            vmem_limit = int(min(max(4 * vmem_need, 16 << 20), caps["vmem_cap"]))
            out = pl.pallas_call(
                _mm_bias_kernel,
                out_shape=jax.ShapeDtypeStruct((Mp, Np), odt),
                grid_spec=pltpu.PrefetchScalarGridSpec(
                    num_scalar_prefetch=0,
                    grid=(n_m, n_n),
                    in_specs=[
                        pl.BlockSpec((tm, Kp), lambda i, j: (i, 0)),   # x
                        pl.BlockSpec((Kp, tn), lambda i, j: (0, j)),   # weight (K-major)
                        pl.BlockSpec((1, tn), lambda i, j: (0, j)),    # bias
                    ],
                    out_specs=pl.BlockSpec((tm, tn), lambda i, j: (i, j)),
                ),
                compiler_params=pltpu.CompilerParams(
                    dimension_semantics=("parallel", "parallel"),
                    vmem_limit_bytes=vmem_limit,
                ),
            )(x2d, w_kmaj, b_pad)
        else:
            vmem_need = (2 * (tm * tk * x_bytes + tk * tn * w_bytes)
                         + 2 * tm * tn * o_bytes + 2 * tn * 4 + tm * tn * 4)
            vmem_limit = int(min(max(4 * vmem_need, 16 << 20), caps["vmem_cap"]))
            out = pl.pallas_call(
                _mm_bias_acc_kernel,
                out_shape=jax.ShapeDtypeStruct((Mp, Np), odt),
                grid_spec=pltpu.PrefetchScalarGridSpec(
                    num_scalar_prefetch=0,
                    grid=(n_m, n_n, n_k),
                    in_specs=[
                        pl.BlockSpec((tm, tk), lambda i, j, k: (i, k)),   # x
                        pl.BlockSpec((tk, tn), lambda i, j, k: (k, j)),   # weight (K-major)
                        pl.BlockSpec((1, tn), lambda i, j, k: (0, j)),    # bias (resident over k)
                    ],
                    out_specs=pl.BlockSpec((tm, tn), lambda i, j, k: (i, j)),
                    scratch_shapes=[pltpu.VMEM((tm, tn), jnp.float32)],
                ),
                compiler_params=pltpu.CompilerParams(
                    dimension_semantics=("parallel", "parallel", "arbitrary"),
                    vmem_limit_bytes=vmem_limit,
                ),
            )(x2d, w_kmaj, b_pad)

        # TODO(synk): Dropout(head_dropout) is identity at inference / p=0; the
        # training-time dropout path is not implemented.
        return out[:M, :tw].reshape(B, n_vars, tw)

    return forward


if __name__ == "__main__":
    # Small shapes consistent with the module's forward:
    # B=2, n_vars=4, d_model=16, patch_num=8 => nf = 128, target_window = 32
    B, n_vars, d_model, patch_num = 2, 4, 16, 8
    nf = d_model * patch_num
    target_window = 32

    key = jax.random.PRNGKey(0)
    kx, kw, kb = jax.random.split(key, 3)

    x = jax.random.normal(kx, (B, n_vars, d_model, patch_num), dtype=jnp.float32)

    # Deterministic params matching nn.Linear's uniform(-1/sqrt(nf), 1/sqrt(nf)).
    bound = 1.0 / (nf ** 0.5)
    weight = jax.random.uniform(kw, (target_window, nf), jnp.float32, -bound, bound)
    bias = jax.random.uniform(kb, (target_window,), jnp.float32, -bound, bound)

    # One-time prep (padded / transposed / bf16 weight cached outside the call).
    fh = jax.jit(make_flatten_head(weight, bias))

    y = fh(x)
    jax.block_until_ready(y)

    # Reference check in plain JAX (same math as the PyTorch forward).
    ref = x.reshape(B, n_vars, nf) @ weight.T + bias
    assert y.shape == (B, n_vars, target_window)
    # bf16 MXU operands with f32 accumulation -> relaxed tolerance vs f32 ref.
    assert jnp.allclose(y, ref, atol=2e-2, rtol=2e-2), float(jnp.max(jnp.abs(y - ref)))

    print("KERNEL_OK")
</pallas_src>

<mosaic_0001>
module attributes {stable_mosaic.version = 11 : i64} {
  func.func @_mm_bias_kernel(%arg0: i32, %arg1: i32, %arg2: memref<8x128xf32, #tpu.memory_space<vmem>>, %arg3: memref<128x128xbf16, #tpu.memory_space<vmem>>, %arg4: memref<1x128xf32, #tpu.memory_space<vmem>>, %arg5: memref<8x128xf32, #tpu.memory_space<vmem>>) attributes {dimension_semantics = [#tpu.dimension_semantics<parallel>, #tpu.dimension_semantics<parallel>], iteration_bounds = array<i64: 1, 1>, scalar_prefetch = 0 : i64, scratch_operands = 0 : i64, tpu.core_type = #tpu.core_type<tc>, window_params = [{transform_indices = @transform_0, window_bounds = array<i64: 8, 128>}, {transform_indices = @transform_1, window_bounds = array<i64: 128, 128>}, {transform_indices = @transform_2, window_bounds = array<i64: 1, 128>}, {transform_indices = @transform_3, window_bounds = array<i64: 8, 128>}]} {
    %c0 = arith.constant 0 : index
    %c0_0 = arith.constant 0 : index
    %0 = vector.load %arg2[%c0, %c0_0] : memref<8x128xf32, #tpu.memory_space<vmem>>, vector<8x128xf32>
    %1 = arith.truncf %0 : vector<8x128xf32> to vector<8x128xbf16>
    %c0_1 = arith.constant 0 : index
    %c0_2 = arith.constant 0 : index
    %2 = vector.load %arg3[%c0_1, %c0_2] : memref<128x128xbf16, #tpu.memory_space<vmem>>, vector<128x128xbf16>
    %cst = arith.constant dense<0.000000e+00> : vector<8x128xf32>
    %3 = tpu.matmul %1, %2, %cst {dimension_numbers = #tpu.dot_dimension_numbers<[1], [0], [0], [1], [0, 0, 1, 1], [], []>} : vector<8x128xbf16>, vector<128x128xbf16>, vector<8x128xf32> -> vector<8x128xf32>
    %c0_3 = arith.constant 0 : index
    %c0_4 = arith.constant 0 : index
    %4 = vector.load %arg4[%c0_3, %c0_4] : memref<1x128xf32, #tpu.memory_space<vmem>>, vector<1x128xf32>
    %5 = vector.broadcast %4 : vector<1x128xf32> to vector<8x128xf32>
    %6 = arith.addf %3, %5 : vector<8x128xf32>
    %c0_5 = arith.constant 0 : index
    %c0_6 = arith.constant 0 : index
    %7 = vector.load %arg5[%c0_5, %c0_6] : memref<8x128xf32, #tpu.memory_space<vmem>>, vector<8x128xf32>
    tpu.vector_store %arg5[%c0_5, %c0_6], %6 {strides = array<i32>} : memref<8x128xf32, #tpu.memory_space<vmem>>, vector<8x128xf32>,
    return
  }
  func.func @transform_0(%arg0: i32, %arg1: i32) -> (i32, i32) {
    %c0_i32 = arith.constant 0 : i32
    %c0_i32_0 = arith.constant 0 : i32
    return %arg0, %c0_i32 : i32, i32
  }
  func.func @transform_1(%arg0: i32, %arg1: i32) -> (i32, i32) {
    %c0_i32 = arith.constant 0 : i32
    %c0_i32_0 = arith.constant 0 : i32
    return %c0_i32, %arg1 : i32, i32
  }
  func.func @transform_2(%arg0: i32, %arg1: i32) -> (i32, i32) {
    %c0_i32 = arith.constant 0 : i32
    %c0_i32_0 = arith.constant 0 : i32
    return %c0_i32, %arg1 : i32, i32
  }
  func.func @transform_3(%arg0: i32, %arg1: i32) -> (i32, i32) {
    %c0_i32 = arith.constant 0 : i32
    return %arg0, %arg1 : i32, i32
  }
}

</mosaic_0001>

<bundles_post_ra>
// kernel: forward.1
= control target key start
LH: loop header
LB: loop body
LE: loop exit
PB: predicated region body
PF: predicated region fallthrough
CT: control target
= control target key end

     0   :  { %s237_s0 = inlined_call_operand.vmem [shape: f32[8,128], index: 0, kind: input, shape index: {}]   ;;  %s238_s1 = inlined_call_operand.vmem [shape: bf16[128,128], index: 1, kind: input, shape index: {}]   ;;  %s239_s2 = inlined_call_operand.vmem [shape: f32[1,128], index: 2, kind: input, shape index: {}]   ;;  %s240_s3 = inlined_call_operand.hbm [shape: f32[8,128], index: 3, kind: output, shape index: {}]  }
   0x1   :  { %v154_v0 = vld [vmem:[%s238_s1 + $0x38] sm:$0xff]  ;;  %v153_v1 = vld [vmem:[%s238_s1 + $0x30] sm:$0xff] }
   0x2   :  { %85 = vmatpush.bf16.msra.mxu0 %v154_v0 }
   0x3   :  { %8 = vsyncpa [#allocation3], 0  ;;  %v152_v2 = vld [vmem:[%s238_s1 + $0x28] sm:$0xff]  ;;  %v151_v3 = vld [vmem:[%s238_s1 + $0x20] sm:$0xff]  ;;  %s183_s5 = smov [#allocation2]   ;;  %s106_s9 = sshll.u32 %s240_s3, 4  ;;  %s107_s9 = int_to_ptr.hbm [resolvable:$true] %s106_s9 }
   0x4   :  { %v150_v4 = vld [vmem:[%s238_s1 + $0x18] sm:$0xff]  ;;  %v149_v5 = vld [vmem:[%s238_s1 + $0x10] sm:$0xff]  ;;  %v148_v6 = vld [vmem:[%s238_s1 + $0x8] sm:$0xff]  ;;  %s104_s6 = sshll.u32 %s183_s5, 4  ;;  %s105_s6 = int_to_ptr.vmem [resolvable:$true] %s104_s6 }
   0x5   :  { %v147_v7 = vld [vmem:[%s238_s1] sm:$0xff] }
   0x6   :  { %86 = vmatpush.bf16.msra.mxu0 %v153_v1  ;;  %v15_v8 = vld [vmem:[%s237_s0] sm:$0xff] }
   0x7   :  { %v16_v9 = vpack.c.bf16 %v15_v8, %v15_v8  ;;  %v156_v10 = vld [vmem:[%s239_s2] ss:$0 sm:$0xff] }
   0xa   :  { %87 = vmatpush.bf16.msra.mxu0 %v152_v2 }
   0xe   :  { %88 = vmatpush.bf16.msra.mxu0 %v151_v3 }
  0x12   :  { %89 = vmatpush.bf16.msra.mxu0 %v150_v4 }
  0x16   :  { %90 = vmatpush.bf16.msra.mxu0 %v149_v5 }
  0x1a   :  { %91 = vmatpush.bf16.msra.mxu0 %v148_v6 }
  0x1e   :  { %92 = vmatpush.bf16.msra.mxu0 %v147_v7 }
  0x21   :  { %93 = vmatmul.bf16.vlgmr.msra.gmra.mxu0 %v16_v9 }
  0x9e   :  { %v94_v11 = vpop.f32.mrf.mxu0 }
  0x9f   :  { %v95_v12 = vadd.f32 %v156_v10, %v94_v11 }
  0xa1   :  { %98 = vst [vmem:[#allocation2] sm:$0xff] %v95_v12 }
  0xa2   :  { %109 = dma.vmem_to_hbm [thread:$0]  %s105_s6, 128, %s107_s9, [#allocation3]  }
  0xa6   :  { %v96_v13 = vpop.f32.mrf.mxu0 }
  0xa7   :  { %181 = dma.done.wait [#allocation3], 128  }
  0xa8   :  { %182 = vsyncadd [#allocation3], 4294967168 }
  0xa9   :  { %114 = vsyncpa [#allocation3], 1 }

</bundles_post_ra>
